<compile_context>
chip_gen: v6e
topology: v6e:2x2x1
jax: 0.10.0
libtpu: 0.0.40
codegen_flags: <defaults>
</compile_context>

<pallas_src>
import functools

import jax
import jax.numpy as jnp
from jax.experimental import pallas as pl
from jax.experimental.pallas import tpu as pltpu

_LANE = 128  # TPU lane width


def _round_up(x, m):
    return ((x + m - 1) // m) * m


def _aggregate_kernel(a_ref, hw_ref, b_ref, o_ref, acc_ref, *, apply_act):
    """One (tm, Cpad) output tile of act(A_hat @ HW + b), K-tiled over N.

    a_ref:  (tm, tk)   bf16 tile of A_hat
    hw_ref: (tk, Cpad) bf16 tile of the pre-transformed features H @ W
    b_ref:  (1, Cpad)  f32 bias
    o_ref:  (tm, Cpad) f32 output tile (written on last K step)
    acc_ref:(tm, Cpad) f32 persistent accumulator
    """
    k = pl.program_id(1)

    @pl.when(k == 0)
    def _():
        acc_ref[...] = jnp.zeros_like(acc_ref)

    acc_ref[...] += jnp.dot(a_ref[...], hw_ref[...],
                            preferred_element_type=jnp.float32)

    @pl.when(k == pl.num_programs(1) - 1)
    def _():
        out = acc_ref[...] + b_ref[...]
        if apply_act:
            out = jnp.maximum(out, 0.0)  # ReLU
        o_ref[...] = out.astype(o_ref.dtype)


def graph_conv(a_hat_padded, n_nodes, h, w, b, *, apply_act, tm=128, tk=128):
    """One GraphConv layer: act(A_hat @ (h @ w) + b).

    a_hat_padded: (Np, Np) bfloat16, zero-padded normalized adjacency
                  (Np a multiple of tm and tk).
    h: (n_nodes, Cin) f32, w: (Cin, Cout) f32, b: (Cout,) f32.
    Returns (n_nodes, Cout) f32.
    """
    Np = a_hat_padded.shape[0]
    Cin, Cout = w.shape
    assert h.shape == (n_nodes, Cin)
    assert Np % tm == 0 and Np % tk == 0
    Cpad = _round_up(Cout, _LANE)

    # Grid-invariant feature transform: hoisted out of the Pallas kernel.
    hw = jnp.dot(h, w, preferred_element_type=jnp.float32)        # (N, Cout)
    hw = jnp.pad(hw, ((0, Np - n_nodes), (0, Cpad - Cout)))       # pad rows/lanes
    hw = hw.astype(jnp.bfloat16)

    b_p = jnp.pad(b, (0, Cpad - Cout)).reshape(1, Cpad).astype(jnp.float32)

    grid = (Np // tm, Np // tk)
    cost = pl.CostEstimate(
        flops=2 * Np * Np * Cpad,
        transcendentals=0,
        bytes_accessed=Np * Np * 2 + Np * Cpad * 2 + Cpad * 4 + Np * Cpad * 4,
    )

    out = pl.pallas_call(
        functools.partial(_aggregate_kernel, apply_act=apply_act),
        out_shape=jax.ShapeDtypeStruct((Np, Cpad), jnp.float32),
        grid_spec=pltpu.PrefetchScalarGridSpec(
            num_scalar_prefetch=0,
            grid=grid,                                   # (row tiles, K tiles)
            in_specs=[
                pl.BlockSpec((tm, tk), lambda i, k: (i, k)),    # A_hat tile
                pl.BlockSpec((tk, Cpad), lambda i, k: (k, 0)),  # HW K-tile
                pl.BlockSpec((1, Cpad), lambda i, k: (0, 0)),   # bias
            ],
            out_specs=pl.BlockSpec((tm, Cpad), lambda i, k: (i, 0)),
            scratch_shapes=[pltpu.VMEM((tm, Cpad), jnp.float32)],
        ),
        compiler_params=pltpu.CompilerParams(
            dimension_semantics=("parallel", "arbitrary"),
            vmem_limit_bytes=32 * 1024 * 1024,
        ),
        cost_estimate=cost,
    )(a_hat_padded, hw, b_p)

    return out[:n_nodes, :Cout]


class GCNPallas:
    """Mirror of the PyTorch GCN module (inference mode)."""

    def __init__(self, a_hat, in_dim, n_hidden, n_classes, n_layers, key,
                 tm=128, tk=128):
        self.n_nodes = a_hat.shape[0]
        self.tm, self.tk = tm, tk
        np_pad = _round_up(self.n_nodes, max(tm, tk))
        pad = np_pad - self.n_nodes
        # Pad once and cast A_hat to bf16 once; reused by every layer.
        self.a_hat_padded = jnp.pad(
            a_hat.astype(jnp.float32), ((0, pad), (0, pad))).astype(jnp.bfloat16)

        self.num_layers = n_layers
        self.params = []
        dims_in = [in_dim] + [n_hidden] * (n_layers - 1)
        dims_out = [n_hidden] * (n_layers - 1) + [n_classes]
        for i in range(n_layers):
            key, kw = jax.random.split(key)
            scale = 1.0 / jnp.sqrt(jnp.float32(dims_in[i]))
            w = jax.random.normal(kw, (dims_in[i], dims_out[i]), jnp.float32) * scale
            b = jnp.zeros((dims_out[i],), jnp.float32)
            self.params.append((w, b))

    def __call__(self, h):
        for l in range(self.num_layers):
            w, b = self.params[l]
            apply_act = l != self.num_layers - 1  # last layer has no activation
            h = graph_conv(self.a_hat_padded, self.n_nodes, h, w, b,
                           apply_act=apply_act, tm=self.tm, tk=self.tk)
            # dropout between layers: identity in inference mode
        return (h, h)


def _reference_forward(a_hat, h, params):
    n_layers = len(params)
    for l, (w, b) in enumerate(params):
        h = a_hat @ (h @ w) + b[None, :]
        if l != n_layers - 1:
            h = jnp.maximum(h, 0.0)
    return h


if __name__ == "__main__":
    # Small shapes: N=200 nodes (ragged vs. 128 tiles on purpose),
    # in_dim=32, hidden=32, classes=8, 2 layers.
    N, IN_DIM, N_HIDDEN, N_CLASSES, N_LAYERS = 200, 32, 32, 8, 2

    key = jax.random.PRNGKey(0)
    k_adj, k_feat, k_param = jax.random.split(key, 3)

    # Build a deterministic random undirected graph and normalize it.
    probs = jax.random.uniform(k_adj, (N, N))
    adj = (probs < 0.1).astype(jnp.float32)
    adj = jnp.maximum(adj, adj.T)                      # symmetric
    adj = adj + jnp.eye(N, dtype=jnp.float32)          # self loops
    deg = adj.sum(axis=1)
    d_inv_sqrt = 1.0 / jnp.sqrt(deg)
    a_hat = adj * d_inv_sqrt[:, None] * d_inv_sqrt[None, :]

    x = jax.random.normal(k_feat, (N, IN_DIM), jnp.float32)

    model = GCNPallas(a_hat, IN_DIM, N_HIDDEN, N_CLASSES, N_LAYERS, k_param)
    out1, out2 = model(x)
    out1 = jax.block_until_ready(out1)
    out2 = jax.block_until_ready(out2)

    ref = _reference_forward(a_hat, x, model.params)
    assert out1.shape == (N, N_CLASSES)
    # bf16 MXU inputs with f32 accumulation => loosen tolerance vs. f32 ref.
    assert jnp.allclose(out1, ref, atol=2e-2, rtol=2e-2)
    assert jnp.allclose(out2, ref, atol=2e-2, rtol=2e-2)

    print("KERNEL_OK")
</pallas_src>

<mosaic_0001>
module attributes {stable_mosaic.version = 11 : i64} {
  func.func @_aggregate_kernel(%arg0: i32, %arg1: i32, %arg2: memref<128x128xbf16, #tpu.memory_space<vmem>>, %arg3: memref<128x128xbf16, #tpu.memory_space<vmem>>, %arg4: memref<1x128xf32, #tpu.memory_space<vmem>>, %arg5: memref<128x128xf32, #tpu.memory_space<vmem>>, %arg6: memref<128x128xf32, #tpu.memory_space<vmem>>) attributes {dimension_semantics = [#tpu.dimension_semantics<parallel>, #tpu.dimension_semantics<arbitrary>], iteration_bounds = array<i64: 2, 2>, scalar_prefetch = 0 : i64, scratch_operands = 1 : i64, tpu.core_type = #tpu.core_type<tc>, window_params = [{transform_indices = @transform_0, window_bounds = array<i64: 128, 128>}, {transform_indices = @transform_1, window_bounds = array<i64: 128, 128>}, {pipeline_mode = #tpu.pipeline_mode<synchronous>, transform_indices = @transform_2, window_bounds = array<i64: 1, 128>}, {transform_indices = @transform_3, window_bounds = array<i64: 128, 128>}]} {
    %c0_i32 = arith.constant 0 : i32
    %0 = arith.cmpi eq, %arg1, %c0_i32 : i32
    %1 = arith.extui %0 : i1 to i32
    %c0_i32_0 = arith.constant 0 : i32
    %2 = arith.cmpi ne, %1, %c0_i32_0 : i32
    scf.if %2 {
      %cst_9 = arith.constant 0.000000e+00 : f32
      %12 = vector.broadcast %cst_9 : f32 to vector<128x128xf32>
      %c0_10 = arith.constant 0 : index
      %c0_11 = arith.constant 0 : index
      %13 = vector.load %arg6[%c0_10, %c0_11] : memref<128x128xf32, #tpu.memory_space<vmem>>, vector<128x128xf32>
      tpu.vector_store %arg6[%c0_10, %c0_11], %12 {strides = array<i32>} : memref<128x128xf32, #tpu.memory_space<vmem>>, vector<128x128xf32>,
    } else {
    }
    %c0 = arith.constant 0 : index
    %c0_1 = arith.constant 0 : index
    %3 = vector.load %arg6[%c0, %c0_1] : memref<128x128xf32, #tpu.memory_space<vmem>>, vector<128x128xf32>
    %c0_2 = arith.constant 0 : index
    %c0_3 = arith.constant 0 : index
    %4 = vector.load %arg2[%c0_2, %c0_3] : memref<128x128xbf16, #tpu.memory_space<vmem>>, vector<128x128xbf16>
    %c0_4 = arith.constant 0 : index
    %c0_5 = arith.constant 0 : index
    %5 = vector.load %arg3[%c0_4, %c0_5] : memref<128x128xbf16, #tpu.memory_space<vmem>>, vector<128x128xbf16>
    %cst = arith.constant dense<0.000000e+00> : vector<128x128xf32>
    %6 = tpu.matmul %4, %5, %cst {dimension_numbers = #tpu.dot_dimension_numbers<[1], [0], [0], [1], [0, 0, 1, 1], [], []>} : vector<128x128xbf16>, vector<128x128xbf16>, vector<128x128xf32> -> vector<128x128xf32>
    %7 = arith.addf %3, %6 : vector<128x128xf32>
    %c0_6 = arith.constant 0 : index
    %c0_7 = arith.constant 0 : index
    %8 = vector.load %arg6[%c0_6, %c0_7] : memref<128x128xf32, #tpu.memory_space<vmem>>, vector<128x128xf32>
    tpu.vector_store %arg6[%c0_6, %c0_7], %7 {strides = array<i32>} : memref<128x128xf32, #tpu.memory_space<vmem>>, vector<128x128xf32>,
    %c1_i32 = arith.constant 1 : i32
    %9 = arith.cmpi eq, %arg1, %c1_i32 : i32
    %10 = arith.extui %9 : i1 to i32
    %c0_i32_8 = arith.constant 0 : i32
    %11 = arith.cmpi ne, %10, %c0_i32_8 : i32
    scf.if %11 {
      %c0_9 = arith.constant 0 : index
      %c0_10 = arith.constant 0 : index
      %12 = vector.load %arg6[%c0_9, %c0_10] : memref<128x128xf32, #tpu.memory_space<vmem>>, vector<128x128xf32>
      %c0_11 = arith.constant 0 : index
      %c0_12 = arith.constant 0 : index
      %13 = vector.load %arg4[%c0_11, %c0_12] : memref<1x128xf32, #tpu.memory_space<vmem>>, vector<1x128xf32>
      %14 = vector.broadcast %13 : vector<1x128xf32> to vector<128x128xf32>
      %15 = arith.addf %12, %14 : vector<128x128xf32>
      %cst_13 = arith.constant 0.000000e+00 : f32
      %16 = vector.broadcast %cst_13 : f32 to vector<128x128xf32>
      %17 = arith.maximumf %15, %16 : vector<128x128xf32>
      %c0_14 = arith.constant 0 : index
      %c0_15 = arith.constant 0 : index
      %18 = vector.load %arg5[%c0_14, %c0_15] : memref<128x128xf32, #tpu.memory_space<vmem>>, vector<128x128xf32>
      tpu.vector_store %arg5[%c0_14, %c0_15], %17 {strides = array<i32>} : memref<128x128xf32, #tpu.memory_space<vmem>>, vector<128x128xf32>,
    } else {
    }
    return
  }
  func.func @transform_0(%arg0: i32, %arg1: i32) -> (i32, i32) {
    %c0_i32 = arith.constant 0 : i32
    return %arg0, %arg1 : i32, i32
  }
  func.func @transform_1(%arg0: i32, %arg1: i32) -> (i32, i32) {
    %c0_i32 = arith.constant 0 : i32
    %c0_i32_0 = arith.constant 0 : i32
    return %arg1, %c0_i32 : i32, i32
  }
  func.func @transform_2(%arg0: i32, %arg1: i32) -> (i32, i32) {
    %c0_i32 = arith.constant 0 : i32
    %c0_i32_0 = arith.constant 0 : i32
    %c0_i32_1 = arith.constant 0 : i32
    return %c0_i32, %c0_i32_0 : i32, i32
  }
  func.func @transform_3(%arg0: i32, %arg1: i32) -> (i32, i32) {
    %c0_i32 = arith.constant 0 : i32
    %c0_i32_0 = arith.constant 0 : i32
    return %arg0, %c0_i32 : i32, i32
  }
}

</mosaic_0001>

<bundles_post_ra>
// kernel: tpu_custom_call.1
= control target key start
LH: loop header
LB: loop body
LE: loop exit
PB: predicated region body
PF: predicated region fallthrough
CT: control target
= control target key end

     0   :  { %s1566_s0 = inlined_call_operand.hbm [shape: bf16[256,256], index: 0, kind: input, shape index: {}]   ;;  %s1567_s1 = inlined_call_operand.hbm [shape: bf16[256,128], index: 1, kind: input, shape index: {}]   ;;  %s1568_s2 = inlined_call_operand.vmem [shape: f32[1,128], index: 2, kind: input, shape index: {}]   ;;  %s1569_s3 = inlined_call_operand.hbm [shape: f32[256,128], index: 3, kind: output, shape index: {}]  }
   0x1   :  { %1576 = sst [smem:[#allocation17_spill]] %s1566_s0 }
   0x2   :  { %1577 = sst [smem:[#allocation18_spill]] %s1567_s1 }
   0x3   :  { %1578 = sst [smem:[#allocation19_spill]] %s1568_s2 }
   0x4   :  { %1579 = sst [smem:[#allocation20_spill]] %s1569_s3 }
   0x5   :  { %8 = vsyncpa [#allocation4], 0 }
   0x6   :  { %10 = vsyncpa [#allocation4 + $0x1], 0 }
   0x7   :  { %11 = vsyncpa [#allocation7], 0 }
   0x8   :  { %13 = vsyncpa [#allocation7 + $0x1], 0 }
   0x9   :  { %14 = vsyncpa [#allocation5], 0 }
   0xa   :  { %16 = vsyncpa [#allocation5 + $0x1], 0  ;;  %s1234_s12 = smov 0   ;;  %s1236_s13 = smov 0  }
   0xb   :  { %s1238_s14 = smov 0   ;;  %s1240_s15 = smov 0  }
   0xc   :  { %s1242_s16 = smov 0   ;;  %s1244_s17 = smov 0  }
   0xd   :  { %s1246_s18 = smov 0   ;;  %s1248_s19 = smov 0  }
   0xe   :  { %s1250_s20 = smov 0   ;;  %s1252_s21 = smov 0  }
   0xf   :  { %s1254_s22 = smov 0   ;;  %s1256_s23 = smov 0  }
  0x10   :  { %s1258_s24 = smov 0   ;;  %s1260_s25 = smov 0  }
  0x11 LB: > { %1580 = sst [smem:[#allocation12_spill]] %s1151_s12  ;;  %s31_s26 = sadd.s32 1, %s1195_s23  ;;  %s1203_s25 = sphi %s1260_s25, %s22_s25   ;;  %s1199_s24 = sphi %s1258_s24, %s1620_s24   ;;  %s1195_s23 = sphi %s1256_s23, %s1619_s23   ;;  %s1191_s22 = sphi %s1254_s22, %s1618_s22   ;;  %s1187_s21 = sphi %s1252_s21, %s1617_s21   ;;  %s1183_s20 = sphi %s1250_s20, %s1616_s20   ;;  %s1179_s19 = sphi %s1248_s19, %s1615_s19   ;;  %s1175_s18 = sphi %s1246_s18, %s1614_s18   ;;  %s1171_s17 = sphi %s1244_s17, %s1613_s17   ;;  %s1167_s16 = sphi %s1242_s16, %s1612_s16   ;;  %s1163_s15 = sphi %s1240_s15, %s1611_s15   ;;  %s1159_s14 = sphi %s1238_s14, %s1610_s14   ;;  %s1155_s13 = sphi %s1236_s13, %s1609_s13   ;;  %s1151_s12 = sphi %s1234_s12, %s1608_s12  }
  0x12   : > { %1581 = sst [smem:[#allocation13_spill]] %s1187_s21  ;;  %s34_s27 = sadd.s32 1, %s1199_s24 }
  0x13   : > { %1582 = sst [smem:[#allocation14_spill]] %s1191_s22  ;;  %p32_p0 = scmp.ge.s32.totalorder %s31_s26, 2 }
  0x14   : > { %s43_s28 = sadd.s32 1, %s1183_s20  ;;  %p50_p1 = scmp.ne.s32.totalorder %s1183_s20, %s1179_s19 }
  0x15   : > { %p51_p2 = scmp.eq.s32.totalorder %s1203_s25, 0  ;;  %s1622_s26 = smov (%p32_p0, %s31_s26), 0 }
  0x16   : > { %1583 = sst [smem:[#allocation15_spill]] %s1622_s26  ;;  %s1624_s27 = smov (!%p32_p0, %s34_s27), %s1199_s24 }
  0x17   : > { %s1315_s29 = ssub.s32 %s1195_s23, %s1622_s26  ;;  %p1319_p3 = por %p51_p2, %p50_p1 }
  0x18   : > { %p36_p4 = scmp.ge.s32.totalorder %s1624_s27, 2  ;;  %p56_p5 = scmp.ne.s32.totalorder %s1179_s19, %s1175_s18 }
  0x19   : > { %p67_p6 = scmp.eq.s32.totalorder %s1315_s29, 0  ;;  %s116_s4 = sadd.s32 1, %s1159_s14 }
  0x1a   : > { %s1626_s27 = smov (%p36_p4, %s1624_s27), 0  ;;  %p1572_p7 = scmp.lt.s32.totalorder %s1203_s25, 4 }
  0x1b   : > { %1585 = sst [smem:[#allocation16_spill]] %s1626_s27  ;;  %s38_s5 = ssub.s32 %s1199_s24, %s1626_s27 }
  0x1c   : > { %s156_s6 = sand.u32 1, %s1183_s20   ;;  %s40_s7 = sor.u32 %s1315_s29, %s38_s5 }
  0x1d   : > { %p114_p8 = scmp.eq.s32.totalorder %s38_s5, 0  ;;  %p41_p9 = scmp.eq.s32.totalorder %s40_s7, 0 }
  0x1e   : > { %s744_s10 = sshll.u32 %s156_s6, 6  ;;  %s779_s11 = sshll.u32 %s1199_s24, 5 }
  0x1f   : > { %s1335_s8 = scalar_select %p114_p8, %s1159_s14, %s116_s4  }
  0x20   : > { %s1338_s9 = scalar_select %p41_p9, %s1183_s20, %s43_s28  }
  0x21   : > { %s166_s26 = sadd.s32 %s1195_s23, %s779_s11  ;;  %s160_s22 = scalar_lea.vmem [#allocation3], %s744_s10 }
  0x22   : > { %s747_s3 = sshll.u32 %s166_s26, 6  ;;  %s169_s2 = sshll.u32 %s160_s22, 4  ;;  %s170_s2 = int_to_ptr.vmem [resolvable:$true] %s169_s2 }
  0x23   : > { %s1586_s0 = sld [smem:[#allocation17_spill]]  ;;  %p1349_p10 = pnand %p1572_p7, %p1319_p3 }
  0x24   : > { %p751_p11 = scmp.ge.s32.totalorder %s1203_s25, 1  ;;  %s157_s28 = scalar_lea.sflag [#allocation4], %s156_s6 }
  0x25   : > { %p1001_p12 = pneg %p1349_p10  ;;  %s1012_s4 = scalar_lea.vmem %s170_s2, 1024 }
  0x26   : > { %p1013_p13 = scmp.ne.s32.totalorder %s170_s2, %s1012_s4  ;;  %s1205_s22 = smov [#allocation3]  }
  0x27   : > { %s1017_s26 = sshll.u32 %s1205_s22, 4  ;;  %s1018_s26 = int_to_ptr.vmem [resolvable:$false] %s1017_s26 }
  0x28   : > { %p1015_p0 = pnand %p1013_p13, %p1001_p12  ;;  %s1019_s1 = scalar_lea.vmem %s1018_s26, 2048 }
  0x29   : > { %s168_s12 = scalar_lea.hbm %s1586_s0, %s747_s3  ;;  %p1020_p4 = scmp.lt.s32.totalorder %s170_s2, %s1018_s26 }
  0x2a   : > { %p1016_p1 = pneg %p1015_p0  ;;  %p1021_p8 = scmp.lt.s32.totalorder %s1019_s1, %s1012_s4 }
  0x2c   : > { %p1022_p9 = por %p1021_p8, %p1020_p4 }
  0x2e   : > { %p1023_p3 = pnand %p1022_p9, %p1016_p1 }
  0x30   : > { %1026 = shalt.err (!%p1023_p3)
}
  0x31   : > { %s1206_s3 = smov 128   ;;  %s1573_s21 = smov 64  }
  0x32   : > { %s1574_s30 = smov 4   ;;  %s1588_s6 = sld [smem:[#allocation12_spill]] }
  0x33   : > { %855 = dma.hbm_to_vmem [thread:$0]  (!%p1349_p10), %s168_s12, 1024, %s170_s2, %s157_s28, %s1206_s3, %s1573_s21, %s1574_s30  }
  0x34   : > { %p198_p12 = scmp.lt.s32.totalorder %s1203_s25, 5  ;;  %s740_s10 = sadd.s32 4294967295, %s1203_s25  }
  0x35   : > { %s741_s11 = sadd.s32 4294967294, %s1203_s25   ;;  %p57_p0 = scmp.eq.s32.totalorder %s740_s10, 0 }
  0x36   : > { %p1363_p13 = pnand %p751_p11, %p198_p12  ;;  %s69_s4 = sadd.s32 1, %s1171_s17 }
  0x37   : > { %s1373_s22 = scalar_select %p67_p6, %s1171_s17, %s69_s4  }
  0x38   : > { %p1378_p1 = por %p57_p0, %p56_p5  ;;  %p76_p10 = scmp.ne.s32.totalorder %s1171_s17, %s1167_s16 }
  0x39   : > { %p82_p11 = scmp.ne.s32.totalorder %s1167_s16, %s1163_s15  ;;  %p126_p4 = scmp.ne.s32.totalorder %s1159_s14, %s1155_s13 }
  0x3a   : > { %p78_p8 = por %p76_p10, %p51_p2  ;;  %p127_p9 = scmp.eq.s32.totalorder %s740_s10, 3 }
  0x3b   : > { %p1390_p3 = por %p82_p11, %p57_p0  ;;  %p132_p12 = scmp.ne.s32.totalorder %s1155_s13, %s1588_s6 }
  0x3c   : > { %p1396_p7 = por %p127_p9, %p126_p4  ;;  %p133_p6 = scmp.eq.s32.totalorder %s741_s11, 3 }
  0x3d   : > { %s179_s18 = sand.u32 1, %s1171_s17   ;;  %s780_s29 = sshll.u32 %s1195_s23, 10 }
  0x3e   : > { %p1402_p5 = por %p133_p6, %p132_p12  ;;  %s748_s15 = sshll.u32 %s179_s18, 6 }
  0x3f   : > { %s1594_s3 = sld [smem:[#allocation18_spill]]  ;;  %p1595_p2 = scmp.lt.s32.totalorder %s1203_s25, 4 }
  0x40   : > { %s183_s6 = scalar_lea.vmem [#allocation6], %s748_s15  ;;  %s180_s11 = scalar_lea.sflag [#allocation7], %s179_s18 }
  0x41   : > { %p1411_p0 = pnand %p1595_p2, %p78_p8  ;;  %s190_s21 = sshll.u32 %s183_s6, 4  ;;  %s191_s21 = int_to_ptr.vmem [resolvable:$true] %s190_s21 }
  0x42   : > { %s1040_s30 = scalar_lea.vmem %s191_s21, 1024  ;;  %s1209_s0 = smov [#allocation6]  }
  0x43   : > { %p1029_p10 = pneg %p1411_p0  ;;  %p1041_p11 = scmp.ne.s32.totalorder %s191_s21, %s1040_s30 }
  0x44   : > { %s1045_s27 = sshll.u32 %s1209_s0, 4  ;;  %s1046_s27 = int_to_ptr.vmem [resolvable:$false] %s1045_s27 }
  0x45   : > { %s189_s10 = scalar_lea.hbm %s1594_s3, %s780_s29  ;;  %p1043_p4 = pnand %p1041_p11, %p1029_p10 }
  0x46   : > { %s1047_s29 = scalar_lea.vmem %s1046_s27, 2048  ;;  %p1048_p12 = scmp.lt.s32.totalorder %s191_s21, %s1046_s27 }
  0x47   : > { %p1044_p9 = pneg %p1043_p4  ;;  %p1049_p8 = scmp.lt.s32.totalorder %s1047_s29, %s1040_s30 }
  0x49   : > { %p1050_p6 = por %p1049_p8, %p1048_p12 }
  0x4b   : > { %p1051_p2 = pnand %p1050_p6, %p1044_p9 }
  0x4d   : > { %1054 = shalt.err (!%p1051_p2)
}
  0x4e   : > { %s1597_s15 = smov 4   ;;  %s1598_s26 = smov 64  }
  0x4f   : > { %858 = dma.hbm_to_vmem [thread:$0]  (!%p1411_p0), %s189_s10, 1024, %s191_s21, %s180_s11, %s1598_s26, %s1598_s26, %s1597_s15  }
  0x50   : > { %202 = sbr.rel (%p1363_p13) target bundleno = 393 (0x189), region = 32  ;;  %s204_s18 = sand.u32 (!%p1363_p13), 1, %s1179_s19  }
  0x51   : > { %s752_s0 = sshll.u32 (!%p1363_p13), %s204_s18, 6  ;;  %s205_s1 = scalar_lea.sflag (!%p1363_p13), [#allocation4], %s204_s18 }
  0x52   : > { %s1425_s3 = scalar_lea.vmem (!%p1363_p13), [#allocation3], %s752_s0 }
  0x55   : > { %1138 = dma.done.wait (%p1378_p1), %s205_s1, 1024  }
  0x56   : > { %1140 = vsyncadd (%p1378_p1), %s205_s1, 4294966272  ;;  %s213_s27 = sand.u32 1, %s1167_s16  }
  0x57   : > { %s753_s30 = sshll.u32 %s213_s27, 6  ;;  %s214_s21 = scalar_lea.sflag [#allocation7], %s213_s27 }
  0x58   : > { %s1432_s10 = scalar_lea.vmem [#allocation6], %s753_s30 }
  0x59   : > { %1142 = dma.done.wait (%p1390_p3), %s214_s21, 1024  }
  0x5a   : > { %1144 = vsyncadd (%p1390_p3), %s214_s21, 4294966272  ;;  %s242_s7 = sand.u32 1, %s1155_s13   ;;  %s1599_s5 = sld [smem:[#allocation13_spill]] }
  0x5b   : > { %s754_s4 = sshll.u32 %s242_s7, 7 }
  0x5c   : > { %s1441_s6 = scalar_lea.vmem [#allocation8], %s754_s4 }
  0x60   : > { %p755_p13 = scmp.ne.s32.totalorder %s1599_s5, 0 }
  0x62   : > { %252 = sbr.rel (%p755_p13) target bundleno = 112 (0x70), region = 44 }
  0x67   : > { %v1210_v0 = vmov 0.0  }
  0x68   : > { %253 = vst [vmem:[#allocation2 + $0x30] sm:$0xff] %v1210_v0  ;;  %254 = vst [vmem:[#allocation2] sm:$0xff] %v1210_v0 }
  0x69   : > { %255 = vst [vmem:[#allocation2 + $0x58] sm:$0xff] %v1210_v0  ;;  %256 = vst [vmem:[#allocation2 + $0x18] sm:$0xff] %v1210_v0 }
  0x6a   : > { %257 = vst [vmem:[#allocation2 + $0x50] sm:$0xff] %v1210_v0  ;;  %258 = vst [vmem:[#allocation2 + $0x68] sm:$0xff] %v1210_v0 }
  0x6b   : > { %259 = vst [vmem:[#allocation2 + $0x8] sm:$0xff] %v1210_v0  ;;  %260 = vst [vmem:[#allocation2 + $0x48] sm:$0xff] %v1210_v0 }
  0x6c   : > { %261 = vst [vmem:[#allocation2 + $0x40] sm:$0xff] %v1210_v0  ;;  %262 = vst [vmem:[#allocation2 + $0x20] sm:$0xff] %v1210_v0 }
  0x6d   : > { %263 = vst [vmem:[#allocation2 + $0x10] sm:$0xff] %v1210_v0  ;;  %264 = vst [vmem:[#allocation2 + $0x38] sm:$0xff] %v1210_v0 }
  0x6e   : > { %265 = vst [vmem:[#allocation2 + $0x60] sm:$0xff] %v1210_v0  ;;  %266 = vst [vmem:[#allocation2 + $0x70] sm:$0xff] %v1210_v0 }
  0x6f   : > { %267 = vst [vmem:[#allocation2 + $0x78] sm:$0xff] %v1210_v0  ;;  %268 = vst [vmem:[#allocation2 + $0x28] sm:$0xff] %v1210_v0 }
  0x70 PF: > { %v983_v1 = vld [vmem:[%s1432_s10 + $0x38] sm:$0xff]   ;;  %v984_v2 = vld [vmem:[%s1432_s10 + $0x30] sm:$0xff]   ;;  %v985_v3 = vld [vmem:[%s1432_s10 + $0x28] sm:$0xff]   ;;  %s1600_s2 = sld [smem:[#allocation13_spill]] }
  0x71   : > { %798 = vmatprep.subr.bf16.mxu0 %v983_v1  ;;  %830 = vmatprep.subr.bf16.mxu1 %v983_v1  ;;  %v986_v4 = vld [vmem:[%s1432_s10 + $0x20] sm:$0xff]   ;;  %v987_v7 = vld [vmem:[%s1432_s10 + $0x18] sm:$0xff]   ;;  %v988_v8 = vld [vmem:[%s1432_s10 + $0x10] sm:$0xff]  }
  0x72   : > { %799 = vmatpush3.bf16.msra.mxu0 %v983_v1  ;;  %838 = vmatpush3.bf16.msra.mxu1 %v983_v1  ;;  %v991_v5 = vld [vmem:[%s1425_s3] sm:$0xff]   ;;  %v989_v9 = vld [vmem:[%s1432_s10 + $0x8] sm:$0xff]   ;;  %v995_v13 = vld [vmem:[%s1425_s3 + $0x10] sm:$0xff]  }
  0x73   : > { %800 = vmatprep.subr.bf16.mxu0 %v984_v2  ;;  %831 = vmatprep.subr.bf16.mxu1 %v984_v2  ;;  %v992_v6 = vld [vmem:[%s1425_s3 + $0x20] sm:$0xff]   ;;  %v993_v11 = vld [vmem:[%s1425_s3 + $0x8] sm:$0xff]   ;;  %v996_v14 = vld [vmem:[%s1425_s3 + $0x30] sm:$0xff]  }
  0x74   : > { %814 = vmatprep.mubr.bf16.mxu0 %v991_v5  ;;  %822 = vmatprep.mubr.bf16.mxu1 %v992_v6  ;;  %v990_v10 = vld [vmem:[%s1432_s10] sm:$0xff]   ;;  %v994_v12 = vld [vmem:[%s1425_s3 + $0x28] sm:$0xff]   ;;  %v997_v15 = vld [vmem:[%s1425_s3 + $0x18] sm:$0xff]  }
  0x75   : > { %v998_v16 = vld [vmem:[%s1425_s3 + $0x38] sm:$0xff]   ;;  %v279_v18 = vld [vmem:[#allocation2 + $0x10] sm:$0xff]  ;;  %v277_v22 = vld [vmem:[#allocation2 + $0x40] sm:$0xff] }
  0x76   : > { %801 = vmatpush3.bf16.msra.mxu0 %v984_v2  ;;  %839 = vmatpush3.bf16.msra.mxu1 %v984_v2  ;;  %v271_v17 = vld [vmem:[#allocation2 + $0x58] sm:$0xff]  ;;  %v269_v21 = vld [vmem:[#allocation2 + $0x30] sm:$0xff]  ;;  %v270_v33 = vld [vmem:[#allocation2] sm:$0xff]  ;;  %p772_p1 = scmp.ne.s32.totalorder %s1600_s2, 1 }
  0x77   : > { %802 = vmatprep.subr.bf16.mxu0 %v985_v3  ;;  %832 = vmatprep.subr.bf16.mxu1 %v985_v3  ;;  %v272_v27 = vld [vmem:[#allocation2 + $0x18] sm:$0xff]  ;;  %v278_v34 = vld [vmem:[#allocation2 + $0x20] sm:$0xff]  ;;  %v275_v39 = vld [vmem:[#allocation2 + $0x8] sm:$0xff]  ;;  %s1601_s15 = sld [smem:[#allocation19_spill]] (!%p772_p1) }
  0x78   : > { %v280_v28 = vld [vmem:[#allocation2 + $0x38] sm:$0xff]  ;;  %v273_v45 = vld [vmem:[#allocation2 + $0x50] sm:$0xff]  ;;  %v281_v46 = vld [vmem:[#allocation2 + $0x60] sm:$0xff] }
  0x79   : > { %v283_v40 = vld [vmem:[#allocation2 + $0x78] sm:$0xff]  ;;  %v276_v51 = vld [vmem:[#allocation2 + $0x48] sm:$0xff]  ;;  %v282_v58 = vld [vmem:[#allocation2 + $0x70] sm:$0xff] }
  0x7a   : > { %803 = vmatpush3.bf16.msra.mxu0 %v985_v3  ;;  %840 = vmatpush3.bf16.msra.mxu1 %v985_v3  ;;  %v284_v52 = vld [vmem:[#allocation2 + $0x28] sm:$0xff] }
  0x7b   : > { %804 = vmatprep.subr.bf16.mxu0 %v986_v4  ;;  %833 = vmatprep.subr.bf16.mxu1 %v986_v4  ;;  %v274_v57 = vld [vmem:[#allocation2 + $0x68] sm:$0xff] }
  0x7e   : > { %805 = vmatpush3.bf16.msra.mxu0 %v986_v4  ;;  %841 = vmatpush3.bf16.msra.mxu1 %v986_v4 }
  0x7f   : > { %806 = vmatprep.subr.bf16.mxu0 %v987_v7  ;;  %834 = vmatprep.subr.bf16.mxu1 %v987_v7 }
  0x82   : > { %807 = vmatpush3.bf16.msra.mxu0 %v987_v7  ;;  %842 = vmatpush3.bf16.msra.mxu1 %v987_v7 }
  0x83   : > { %808 = vmatprep.subr.bf16.mxu0 %v988_v8  ;;  %835 = vmatprep.subr.bf16.mxu1 %v988_v8 }
  0x86   : > { %809 = vmatpush3.bf16.msra.mxu0 %v988_v8  ;;  %843 = vmatpush3.bf16.msra.mxu1 %v988_v8 }
  0x87   : > { %810 = vmatprep.subr.bf16.mxu0 %v989_v9  ;;  %836 = vmatprep.subr.bf16.mxu1 %v989_v9 }
  0x8a   : > { %811 = vmatpush3.bf16.msra.mxu0 %v989_v9  ;;  %844 = vmatpush3.bf16.msra.mxu1 %v989_v9 }
  0x8b   : > { %812 = vmatprep.subr.bf16.mxu0 %v990_v10  ;;  %837 = vmatprep.subr.bf16.mxu1 %v990_v10 }
  0x8e   : > { %813 = vmatpush3.bf16.msra.mxu0 %v990_v10  ;;  %845 = vmatpush3.bf16.msra.mxu1 %v990_v10 }
  0x91   : > { %815 = vmatmul.mubr.bf16.vlgmr.msra.gmra.mxu0 %v993_v11  ;;  %823 = vmatmul.mubr.bf16.vlgmr.msra.gmra.mxu1 %v994_v12 }
  0x92   : > { %818 = vmatprep.mubr.bf16.mxu0 %v995_v13  ;;  %826 = vmatprep.mubr.bf16.mxu1 %v996_v14 }
  0x99   : > { %819 = vmatmul.mubr.bf16.gmra.mxu0 %v997_v15  ;;  %827 = vmatmul.mubr.bf16.gmra.mxu1 %v998_v16 }
 0x151   : > { %v816_v19 = vpop.f32.mrf.mxu0  ;;  %v824_v20 = vpop.f32.mrf.mxu1 }
 0x152   : > { %v512_v23 = vadd.f32 %v816_v19, %v271_v17  ;;  %v520_v24 = vadd.f32 %v824_v20, %v279_v18 }
 0x153   : > { %v447_v25 = vpop.f32.mrf.mxu0  ;;  %v479_v26 = vpop.f32.mrf.mxu1 }
 0x154   : > { %528 = vst [vmem:[#allocation2 + $0x58] sm:$0xff] %v512_v23  ;;  %536 = vst [vmem:[#allocation2 + $0x10] sm:$0xff] %v520_v24  ;;  %v510_v29 = vadd.f32 %v447_v25, %v269_v21  ;;  %v518_v30 = vadd.f32 %v479_v26, %v277_v22 }
 0x155   : > { %v817_v31 = vpop.f32.mrf.mxu0  ;;  %v825_v32 = vpop.f32.mrf.mxu1 }
 0x156   : > { %526 = vst [vmem:[#allocation2 + $0x30] sm:$0xff] %v510_v29  ;;  %534 = vst [vmem:[#allocation2 + $0x40] sm:$0xff] %v518_v30  ;;  %v513_v35 = vadd.f32 %v817_v31, %v272_v27  ;;  %v521_v36 = vadd.f32 %v825_v32, %v280_v28 }
 0x157   : > { %v450_v37 = vpop.f32.mrf.mxu0  ;;  %v482_v38 = vpop.f32.mrf.mxu1 }
 0x158   : > { %529 = vst [vmem:[#allocation2 + $0x18] sm:$0xff] %v513_v35  ;;  %537 = vst [vmem:[#allocation2 + $0x38] sm:$0xff] %v521_v36  ;;  %v511_v41 = vadd.f32 %v450_v37, %v270_v33  ;;  %v519_v42 = vadd.f32 %v482_v38, %v278_v34 }
 0x159   : > { %v820_v43 = vpop.f32.mrf.mxu0  ;;  %v828_v44 = vpop.f32.mrf.mxu1 }
 0x15a   : > { %527 = vst [vmem:[#allocation2] sm:$0xff] %v511_v41  ;;  %535 = vst [vmem:[#allocation2 + $0x20] sm:$0xff] %v519_v42  ;;  %v516_v47 = vadd.f32 %v820_v43, %v275_v39  ;;  %v524_v48 = vadd.f32 %v828_v44, %v283_v40 }
 0x15b   : > { %v463_v49 = vpop.f32.mrf.mxu0  ;;  %v495_v50 = vpop.f32.mrf.mxu1 }
 0x15c   : > { %532 = vst [vmem:[#allocation2 + $0x8] sm:$0xff] %v516_v47  ;;  %540 = vst [vmem:[#allocation2 + $0x78] sm:$0xff] %v524_v48  ;;  %v514_v53 = vadd.f32 %v463_v49, %v273_v45  ;;  %v522_v54 = vadd.f32 %v495_v50, %v281_v46 }
 0x15d   : > { %v821_v55 = vpop.f32.mrf.mxu0  ;;  %v829_v56 = vpop.f32.mrf.mxu1 }
 0x15e   : > { %530 = vst [vmem:[#allocation2 + $0x50] sm:$0xff] %v514_v53  ;;  %538 = vst [vmem:[#allocation2 + $0x60] sm:$0xff] %v522_v54  ;;  %v517_v59 = vadd.f32 %v821_v55, %v276_v51  ;;  %v525_v60 = vadd.f32 %v829_v56, %v284_v52  ;;  %545 = sbr.rel (%p772_p1) target bundleno = 368 (0x170), region = 48 }
 0x15f   : > { %v466_v61 = vpop.f32.mrf.mxu0  ;;  %v498_v62 = vpop.f32.mrf.mxu1 }
 0x160   : > { %533 = vst [vmem:[#allocation2 + $0x48] sm:$0xff] %v517_v59  ;;  %541 = vst [vmem:[#allocation2 + $0x28] sm:$0xff] %v525_v60  ;;  %v515_v63 = vadd.f32 %v466_v61, %v274_v57  ;;  %v523_v0 = vadd.f32 %v498_v62, %v282_v58 }
 0x162   : > { %531 = vst [vmem:[#allocation2 + $0x68] sm:$0xff] %v515_v63  ;;  %539 = vst [vmem:[#allocation2 + $0x70] sm:$0xff] %v523_v0 }
 0x163   : > { %v546_v1 = vld [vmem:[#allocation2 + $0x30] sm:$0xff]  ;;  %v773_v2 = vld [vmem:[%s1601_s15] ss:$0 sm:$0xff]  ;;  %v548_v6 = vld [vmem:[#allocation2 + $0x58] sm:$0xff] }
 0x164   : > { %v547_v3 = vld [vmem:[#allocation2] sm:$0xff]  ;;  %v569_v4 = vadd.f32 %v773_v2, %v546_v1  ;;  %v549_v7 = vld [vmem:[#allocation2 + $0x18] sm:$0xff]  ;;  %v571_v9 = vadd.f32 %v773_v2, %v548_v6  ;;  %v552_v13 = vld [vmem:[#allocation2 + $0x8] sm:$0xff] }
 0x165   : > { %v570_v5 = vadd.f32 %v773_v2, %v547_v3  ;;  %v550_v8 = vld [vmem:[#allocation2 + $0x50] sm:$0xff]  ;;  %v572_v10 = vadd.f32 %v773_v2, %v549_v7  ;;  %v575_v18 = vadd.f32 %v773_v2, %v552_v13  ;;  %v554_v19 = vld [vmem:[#allocation2 + $0x40] sm:$0xff]  ;;  %v557_v26 = vld [vmem:[#allocation2 + $0x38] sm:$0xff] }
 0x166   : > { %v573_v11 = vadd.f32 %v773_v2, %v550_v8  ;;  %v585_v15 = vmax.f32 %v569_v4, 0.0  ;;  %v555_v20 = vld [vmem:[#allocation2 + $0x20] sm:$0xff]  ;;  %v556_v21 = vld [vmem:[#allocation2 + $0x10] sm:$0xff]  ;;  %v587_v22 = vmax.f32 %v571_v9, 0.0  ;;  %v577_v31 = vadd.f32 %v773_v2, %v554_v19  ;;  %v560_v33 = vld [vmem:[#allocation2 + $0x78] sm:$0xff] }
 0x167   : > { %v553_v14 = vld [vmem:[#allocation2 + $0x48] sm:$0xff]  ;;  %v586_v16 = vmax.f32 %v570_v5, 0.0  ;;  %v588_v23 = vmax.f32 %v572_v10, 0.0  ;;  %v558_v27 = vld [vmem:[#allocation2 + $0x60] sm:$0xff]  ;;  %v591_v30 = vmax.f32 %v575_v18, 0.0  ;;  %v578_v32 = vadd.f32 %v773_v2, %v555_v20 }
 0x168   : > { %v589_v24 = vmax.f32 %v573_v11, 0.0  ;;  %v576_v25 = vadd.f32 %v773_v2, %v553_v14  ;;  %601 = vst [vmem:[%s1441_s6] sm:$0xff] %v585_v15  ;;  %v561_v34 = vld [vmem:[#allocation2 + $0x28] sm:$0xff]  ;;  %603 = vst [vmem:[%s1441_s6 + $0x10] sm:$0xff] %v587_v22  ;;  %v579_v36 = vadd.f32 %v773_v2, %v556_v21  ;;  %v580_v37 = vadd.f32 %v773_v2, %v557_v26 }
 0x169   : > { %v551_v12 = vld [vmem:[#allocation2 + $0x68] sm:$0xff]  ;;  %v559_v28 = vld [vmem:[#allocation2 + $0x70] sm:$0xff]  ;;  %602 = vst [vmem:[%s1441_s6 + $0x8] sm:$0xff] %v586_v16  ;;  %604 = vst [vmem:[%s1441_s6 + $0x18] sm:$0xff] %v588_v23  ;;  %v581_v38 = vadd.f32 %v773_v2, %v558_v27  ;;  %v593_v39 = vmax.f32 %v577_v31, 0.0  ;;  %v594_v40 = vmax.f32 %v578_v32, 0.0  ;;  %v583_v42 = vadd.f32 %v773_v2, %v560_v33 }
 0x16a   : > { %v574_v17 = vadd.f32 %v773_v2, %v551_v12  ;;  %605 = vst [vmem:[%s1441_s6 + $0x20] sm:$0xff] %v589_v24  ;;  %v592_v35 = vmax.f32 %v576_v25, 0.0  ;;  %607 = vst [vmem:[%s1441_s6 + $0x30] sm:$0xff] %v591_v30  ;;  %v582_v41 = vadd.f32 %v773_v2, %v559_v28  ;;  %v595_v43 = vmax.f32 %v579_v36, 0.0 }
 0x16b   : > { %v596_v44 = vmax.f32 %v580_v37, 0.0  ;;  %v597_v45 = vmax.f32 %v581_v38, 0.0  ;;  %v584_v46 = vadd.f32 %v773_v2, %v561_v34  ;;  %609 = vst [vmem:[%s1441_s6 + $0x40] sm:$0xff] %v593_v39  ;;  %610 = vst [vmem:[%s1441_s6 + $0x48] sm:$0xff] %v594_v40  ;;  %v599_v48 = vmax.f32 %v583_v42, 0.0 }
 0x16c   : > { %v590_v29 = vmax.f32 %v574_v17, 0.0  ;;  %608 = vst [vmem:[%s1441_s6 + $0x38] sm:$0xff] %v592_v35  ;;  %v598_v47 = vmax.f32 %v582_v41, 0.0  ;;  %611 = vst [vmem:[%s1441_s6 + $0x50] sm:$0xff] %v595_v43 }
 0x16d   : > { %612 = vst [vmem:[%s1441_s6 + $0x58] sm:$0xff] %v596_v44  ;;  %613 = vst [vmem:[%s1441_s6 + $0x60] sm:$0xff] %v597_v45  ;;  %v600_v49 = vmax.f32 %v584_v46, 0.0 }
 0x16e   : > { %606 = vst [vmem:[%s1441_s6 + $0x28] sm:$0xff] %v590_v29  ;;  %614 = vst [vmem:[%s1441_s6 + $0x68] sm:$0xff] %v598_v47 }
 0x16f   : > { %615 = vst [vmem:[%s1441_s6 + $0x70] sm:$0xff] %v599_v48  ;;  %616 = vst [vmem:[%s1441_s6 + $0x78] sm:$0xff] %v600_v49 }
 0x170 PF: > { %s1602_s26 = sld [smem:[#allocation14_spill]]  ;;  %s631_s30 = sshll.u32 %s1441_s6, 4  ;;  %s1487_s30 = int_to_ptr.vmem [resolvable:$true] %s631_s30 }
 0x171   : > { %s1603_s3 = sld [smem:[#allocation20_spill]]  ;;  %s1491_s21 = scalar_lea.sflag [#allocation5], %s242_s7 }
 0x172   : > { %s1055_s10 = scalar_lea.vmem %s1487_s30, 2048  ;;  %s1211_s4 = smov [#allocation8]  }
 0x173   : > { %p1056_p3 = scmp.ne.s32.totalorder %s1487_s30, %s1055_s10  ;;  %s1059_s5 = sshll.u32 %s1211_s4, 4  ;;  %s1060_s5 = int_to_ptr.vmem [resolvable:$false] %s1059_s5 }
 0x174   : > { %s1061_s2 = scalar_lea.vmem %s1060_s5, 4096  ;;  %p1062_p11 = scmp.lt.s32.totalorder %s1487_s30, %s1060_s5 }
 0x175   : > { %p1057_p0 = pnand %p1056_p3, %p1396_p7  ;;  %p1063_p4 = scmp.lt.s32.totalorder %s1061_s2, %s1055_s10 }
 0x176   : > { %s781_s18 = sshll.u32 %s1602_s26, 11 }
 0x177   : > { %s1484_s27 = scalar_lea.hbm %s1603_s3, %s781_s18  ;;  %p1058_p10 = pneg %p1057_p0 }
 0x178   : > { %p1064_p9 = por %p1063_p4, %p1062_p11 }
 0x17a   : > { %p1065_p12 = pnand %p1064_p9, %p1058_p10 }
 0x17c   : > { %1068 = shalt.err (!%p1065_p12)
}
 0x17d   : > { %s1069_s7 = scalar_lea.hbm %s1484_s27, 2048  ;;  %s1073_s29 = scalar_lea.hbm %s1603_s3, 4096 }
 0x17e   : > { %p1070_p8 = scmp.ne.s32.totalorder %s1484_s27, %s1069_s7  ;;  %p1074_p13 = scmp.lt.s32.totalorder %s1484_s27, %s1603_s3 }
 0x17f   : > { %p1075_p1 = scmp.lt.s32.totalorder %s1073_s29, %s1069_s7 }
 0x180   : > { %p1071_p6 = pnand %p1070_p8, %p1396_p7 }
 0x181   : > { %p1076_p3 = por %p1075_p1, %p1074_p13 }
 0x182   : > { %p1072_p2 = pneg %p1071_p6 }
 0x184   : > { %p1077_p0 = pnand %p1076_p3, %p1072_p2 }
 0x186   : > { %1080 = shalt.err (!%p1077_p0)
}
 0x187   : > { %s1212_s18 = smov 128   ;;  %s1213_s0 = smov 8  }
 0x188   : > { %850 = dma.vmem_to_hbm [thread:$0]  (%p1396_p7), %s1487_s30, 2048, %s1484_s27, %s1491_s21, %s1212_s18, %s1212_s18, %s1213_s0  }
 0x189 PF: > { %s1604_s1 = sld [smem:[#allocation12_spill]]  ;;  %p864_p10 = scmp.ge.s32.totalorder %s1203_s25, 2 }
 0x18b   : > { %p860_p11 = pnand %p864_p10, %p1402_p5 }
 0x18d   : > { %p861_p4 = pneg %p860_p11 }
 0x18f   : > { %s646_s10 = sand.u32 1, %s1604_s1  }
 0x190   : > { %s647_s4 = scalar_lea.sflag [#allocation5], %s646_s10 }
 0x191   : > { %1146 = dma.done.wait (%p861_p4), %s647_s4, 2048  }
 0x192   : > { %1148 = vsyncadd (%p861_p4), %s647_s4, 4294965248  ;;  %s22_s25 = sadd.s32 1, %s1203_s25   ;;  %s1606_s28 = sld [smem:[#allocation15_spill]] }
 0x193   : > { %p1519_p9 = scmp.ge.s32.totalorder %s22_s25, 6   ;;  %s1607_s27 = sld [smem:[#allocation16_spill]] }
 0x194   : > { %s1608_s12 = smov %s1155_s13  ;;  %s1609_s13 = smov %s1159_s14 }
 0x195   : > { %s1610_s14 = smov %s1335_s8  ;;  %s1611_s15 = smov %s1167_s16 }
 0x196   : > { %s1612_s16 = smov %s1171_s17  ;;  %s1613_s17 = smov %s1373_s22 }
 0x197   : > { %s1614_s18 = smov %s1179_s19  ;;  %s1615_s19 = smov %s1183_s20 }
 0x198   : > { %s1616_s20 = smov %s1338_s9  ;;  %s1617_s21 = smov %s1195_s23 }
 0x199   : > { %s1618_s22 = smov %s1199_s24  ;;  %s1619_s23 = smov %s1606_s28 }
 0x19a   : > { %s1620_s24 = smov %s1607_s27  ;;  %21 = sbr.rel (!%p1519_p9) target bundleno = 17 (0x11), region = 98 }
 0x19f   :  { %652 = vsyncpa [#allocation4], 1 }
 0x1a0   :  { %654 = vsyncpa [#allocation4 + $0x1], 1 }
 0x1a1   :  { %655 = vsyncpa [#allocation7], 1 }
 0x1a2   :  { %657 = vsyncpa [#allocation7 + $0x1], 1 }
 0x1a3   :  { %658 = vsyncpa [#allocation5], 1 }
 0x1a4   :  { %660 = vsyncpa [#allocation5 + $0x1], 1 }

</bundles_post_ra>
